<compile_context>
chip_gen: v7x
topology: tpu7x:2x2x1
jax: 0.10.0
libtpu: 0.0.40
codegen_flags: <defaults>
</compile_context>

<pallas_src>
import functools

import numpy as np

import jax
import jax.numpy as jnp
from jax import lax
from jax.experimental import pallas as pl
from jax.experimental.pallas import tpu as pltpu


HIDDEN_DIMS = (64, 32)   # ConvLSTM(input_dim=128, hidden_dim=[64, 32], kernel_size=(3, 3))
KSIZE = 3


# -----------------------------------------------------------------------------
# Fused multi-layer ConvLSTM Pallas kernel (whole sequence per grid step)
# -----------------------------------------------------------------------------
def _fused_convlstm_kernel(*refs, hidden_dims, shifts):
    """refs = (x_taps, mask, [wx, wh, bias] * n_layers, y, [h, c] * n_layers).

    x_taps : (T, spad, n_taps*C0) bf16  -- layer-0 im2col built once in the wrapper
    wx     : (n_taps*cin_l, 4*ch) bf16  -- tap-stacked input-path weights
    wh     : (n_taps*ch,    4*ch) bf16  -- tap-stacked recurrent-path weights
    bias   : (1, 4*ch) f32
    y      : (T, spad, ch_last) f32
    h, c   : (spad, ch) f32             -- output blocks double as the recurrent state
    """
    n_layers = len(hidden_dims)
    n_in = 2 + 3 * n_layers
    x_ref, mask_ref = refs[0], refs[1]
    w_refs = refs[2:n_in]
    y_ref = refs[n_in]
    state_refs = refs[n_in + 1:]

    seq_len, spad = x_ref.shape[0], x_ref.shape[1]

    # Recurrent state lives directly in the VMEM-resident state output blocks; reset
    # once per batch element (no per-step @pl.when, no scratch, no duplicate stores).
    for s in state_refs:
        s[...] = jnp.zeros_like(s)

    keep = mask_ref[...] > 0.0            # (spad, 1): interior of the padded frame

    # Bias broadcasts hoisted out of the time loop (JAX does not CSE broadcast_in_dim).
    biases = [jnp.broadcast_to(w_refs[3 * l + 2][...], (spad, 4 * ch))
              for l, ch in enumerate(hidden_dims)]

    def tap_stack(a_bf16):
        # Stack the K*K conv taps along lanes: out[p, k*ch + c] = a[p + off_k, c].
        # Rolls hit the XLU; the single dot against the tap-stacked weight uses the MXU.
        return jnp.concatenate(
            [a_bf16 if sh == 0 else pltpu.roll(a_bf16, sh, axis=0) for sh in shifts],
            axis=-1)

    @pl.loop(0, seq_len)
    def _step(t):
        inp_taps = x_ref[t]               # (spad, n_taps*C0) bf16, halo rows are zero
        y_t = None
        for layer, ch in enumerate(hidden_dims):
            wx_ref = w_refs[3 * layer]
            wh_ref = w_refs[3 * layer + 1]
            h_ref = state_refs[2 * layer]
            c_ref = state_refs[2 * layer + 1]

            h_taps = tap_stack(h_ref[...].astype(jnp.bfloat16))   # (spad, n_taps*ch)

            acc = biases[layer]
            acc = acc + jnp.dot(inp_taps, wx_ref[...],
                                preferred_element_type=jnp.float32)
            acc = acc + jnp.dot(h_taps, wh_ref[...],
                                preferred_element_type=jnp.float32)

            # Gate order matches torch.split(conv, ch, dim=1): input, forget, output,
            # cell.  One batched sigmoid over the first 3*ch lanes (single EUP push).
            sig = jax.nn.sigmoid(acc[:, :3 * ch])
            i_g = sig[:, 0 * ch:1 * ch]
            f_g = sig[:, 1 * ch:2 * ch]
            o_g = sig[:, 2 * ch:3 * ch]
            g_g = jnp.tanh(acc[:, 3 * ch:4 * ch])

            c_next = f_g * c_ref[...] + i_g * g_g
            h_next = o_g * jnp.tanh(c_next)

            # Keep halo rows exactly zero so the roll-based 'same' zero padding of the
            # next step / next layer stays valid.
            h_next = jnp.where(keep, h_next, 0.0)
            c_next = jnp.where(keep, c_next, 0.0)
            h_ref[...] = h_next
            c_ref[...] = c_next

            if layer < n_layers - 1:
                inp_taps = tap_stack(h_next.astype(jnp.bfloat16))
            else:
                y_t = h_next

        y_ref[t] = y_t                    # last layer's h_t


def convlstm_forward_pallas(x_nhwc, layer_params, hidden_dims, *, roll_sign=1):
    """Multi-layer ConvLSTM forward (batch_first), fused into one pallas_call.

    x_nhwc : (B, T, H, W, C_in) float32
    layer_params[l] = (w_hwio (K, K, C_in_l + ch_l, 4*ch_l) f32, bias (4*ch_l,) f32)
    Returns y (B, T, H, W, ch_last) and [(h_l, c_l)] in NHWC layout.
    """
    B, T, H, W, C0 = x_nhwc.shape
    K = layer_params[0][0].shape[0]
    P = K // 2
    HP, WP = H + 2 * P, W + 2 * P
    core = HP * WP
    spad = ((core + 7) // 8) * 8          # sublane-aligned padded flat spatial size
    n_layers = len(hidden_dims)
    n_taps = K * K

    # Conv tap offsets in the flattened padded frame.
    offs = [dy * WP + dx for dy in range(-P, P + 1) for dx in range(-P, P + 1)]

    # Roll-based halo safety: tap reads issued from interior rows must never wrap
    # around the flattened padded frame (would silently corrupt interior rows).
    max_off = max(abs(o) for o in offs)
    interior_lo = P * WP + P
    interior_hi = (H - 1 + P) * WP + (W - 1 + P)
    assert interior_lo - max_off >= 0, "conv taps would wrap below row 0"
    assert interior_hi + max_off <= spad - 1, "conv taps would wrap past spad"

    # In-kernel pltpu.roll shifts (jnp.roll convention; sign probed once at setup).
    kshifts = tuple(int((roll_sign * (-o)) % spad) for o in offs)

    # ---- once-per-sequence layout prep (outside the recurrent loop) ----------
    xp = jnp.pad(x_nhwc, ((0, 0), (0, 0), (P, P), (P, P), (0, 0)))
    xp = xp.reshape(B, T, core, C0)
    if spad != core:
        xp = jnp.pad(xp, ((0, 0), (0, 0), (0, spad - core), (0, 0)))
    # Layer-0 im2col: n_taps shifted copies stacked along channels, streamed as bf16.
    x_taps = jnp.concatenate([jnp.roll(xp, -o, axis=2) for o in offs],
                             axis=-1).astype(jnp.bfloat16)      # (B,T,spad,n_taps*C0)

    mask_np = np.zeros((HP, WP), np.float32)
    mask_np[P:P + H, P:P + W] = 1.0
    mask = jnp.asarray(np.pad(mask_np.reshape(-1), (0, spad - core)).reshape(spad, 1))

    # Split each layer's weight along the contraction axis into an x-part and an
    # h-part, stack the K*K taps along the contraction dim, pre-cast to bf16.
    flat_weights = []
    in_specs = [
        pl.BlockSpec((None, T, spad, n_taps * C0), lambda b: (b, 0, 0, 0)),
        pl.BlockSpec((spad, 1), lambda b: (0, 0)),
    ]
    cin = C0
    for layer, ch in enumerate(hidden_dims):
        w, bias = layer_params[layer]
        w = w.reshape(n_taps, cin + ch, 4 * ch)
        wx = w[:, :cin, :].reshape(n_taps * cin, 4 * ch).astype(jnp.bfloat16)
        wh = w[:, cin:, :].reshape(n_taps * ch, 4 * ch).astype(jnp.bfloat16)
        flat_weights += [wx, wh, bias.reshape(1, 4 * ch).astype(jnp.float32)]
        in_specs += [
            pl.BlockSpec((n_taps * cin, 4 * ch), lambda b: (0, 0)),
            pl.BlockSpec((n_taps * ch, 4 * ch), lambda b: (0, 0)),
            pl.BlockSpec((1, 4 * ch), lambda b: (0, 0)),
        ]
        cin = ch

    ch_last = hidden_dims[-1]
    out_shape = [jax.ShapeDtypeStruct((B, T, spad, ch_last), jnp.float32)]
    out_specs = [pl.BlockSpec((None, T, spad, ch_last), lambda b: (b, 0, 0, 0))]
    for ch in hidden_dims:
        for _ in range(2):   # h, c  (these blocks double as the recurrent state)
            out_shape.append(jax.ShapeDtypeStruct((B, spad, ch), jnp.float32))
            out_specs.append(pl.BlockSpec((None, spad, ch), lambda b: (b, 0, 0)))

    kernel = functools.partial(_fused_convlstm_kernel,
                               hidden_dims=tuple(hidden_dims), shifts=kshifts)

    # TODO(synk): on single-TensorCore chips (v5e/v6e) folding B into the matmul M
    # dimension (one grid step, blocks of (B, spad, C)) would double MXU row occupancy;
    # grid=(B,) "parallel" is kept so v7x shards batch elements across its 2 TCs.
    outs = pl.pallas_call(
        kernel,
        out_shape=tuple(out_shape),
        grid=(B,),
        in_specs=in_specs,
        out_specs=tuple(out_specs),
        compiler_params=pltpu.CompilerParams(dimension_semantics=("parallel",)),
    )(x_taps, mask, *flat_weights)

    def unpad(a):            # (..., spad, ch) -> (..., H, W, ch)
        a = a[..., :core, :]
        a = a.reshape(a.shape[:-2] + (HP, WP, a.shape[-1]))
        return a[..., P:P + H, P:P + W, :]

    y = unpad(outs[0])
    states = [(unpad(outs[1 + 2 * l]), unpad(outs[2 + 2 * l])) for l in range(n_layers)]
    return y, states


def _probe_roll_convention():
    """pltpu.roll is documented to follow jnp.roll; probe it once so the static
    conv-tap shifts can never be built with a flipped sign convention."""
    def k(x_ref, o_ref):
        o_ref[...] = pltpu.roll(x_ref[...], 1, axis=0)

    x = np.arange(8 * 128, dtype=np.float32).reshape(8, 128)
    out = np.asarray(
        pl.pallas_call(k, out_shape=jax.ShapeDtypeStruct((8, 128), jnp.float32))(
            jnp.asarray(x)))
    return 1 if np.array_equal(out, np.roll(x, 1, axis=0)) else -1


# -----------------------------------------------------------------------------
# Pure-JAX reference ConvLSTM (lax conv, same bf16-operand / f32-accumulate numerics)
# -----------------------------------------------------------------------------
def convlstm_forward_reference(x_nhwc, layer_params, hidden_dims):
    B, T, H, W, _ = x_nhwc.shape
    cur = x_nhwc
    states = []
    for layer, ch in enumerate(hidden_dims):
        w, bias = layer_params[layer]
        wb = w.astype(jnp.bfloat16)
        h = jnp.zeros((B, H, W, ch), jnp.float32)
        c = jnp.zeros((B, H, W, ch), jnp.float32)
        outs = []
        for t in range(T):
            comb = jnp.concatenate([cur[:, t], h], axis=-1).astype(jnp.bfloat16)
            conv = lax.conv_general_dilated(
                comb, wb, (1, 1), "SAME",
                dimension_numbers=("NHWC", "HWIO", "NHWC"),
                preferred_element_type=jnp.float32) + bias
            i_g = jax.nn.sigmoid(conv[..., 0 * ch:1 * ch])
            f_g = jax.nn.sigmoid(conv[..., 1 * ch:2 * ch])
            o_g = jax.nn.sigmoid(conv[..., 2 * ch:3 * ch])
            g_g = jnp.tanh(conv[..., 3 * ch:4 * ch])
            c = f_g * c + i_g * g_g
            h = o_g * jnp.tanh(c)
            outs.append(h)
        cur = jnp.stack(outs, axis=1)
        states.append((h, c))
    return cur, states


# -----------------------------------------------------------------------------
# Encoder (SimpleCNN) and decoder (ConvTranspose2d stack), plain XLA convs
# -----------------------------------------------------------------------------
def _encoder(x_nhwc, enc_params):
    """SimpleCNN: 3 x (conv3x3 'same' + ReLU + maxpool 2x2 stride 2)."""
    h = x_nhwc
    for w, b in enc_params:
        h = lax.conv_general_dilated(
            h, w, (1, 1), "SAME", dimension_numbers=("NHWC", "HWIO", "NHWC")) + b
        h = jax.nn.relu(h)
        h = lax.reduce_window(h, -jnp.inf, lax.max,
                              (1, 2, 2, 1), (1, 2, 2, 1), "VALID")
    return h


def _decoder(x_nhwc, dec_params):
    """ConvTranspose2d(k=4, s=2, p=1) x 3 (ReLU, ReLU, Tanh) as input-dilated convs.

    Self-consistent with the randomly initialized HWIO weights below; porting real
    PyTorch ConvTranspose2d weights would additionally require a kernel flip/transpose.
    """
    h = x_nhwc
    for i, (w, b) in enumerate(dec_params):
        h = lax.conv_general_dilated(
            h, w, (1, 1), ((2, 2), (2, 2)), lhs_dilation=(2, 2),
            dimension_numbers=("NHWC", "HWIO", "NHWC")) + b
        h = jnp.tanh(h) if i == len(dec_params) - 1 else jax.nn.relu(h)
    return h


def storm_generator_forward(input_imgs, params, *, roll_sign=1, use_pallas=True):
    """StormGenerator.forward: encoder -> ConvLSTM -> last time step -> decoder.

    input_imgs: (B, T, 1, H, W)   (same axis order as the PyTorch module)
    Returns (output_image (B, 1, H, W), convlstm_y, convlstm_states).
    """
    B, T, C, H, W = input_imgs.shape
    x = jnp.transpose(input_imgs.reshape(B * T, C, H, W), (0, 2, 3, 1))   # NHWC
    feat = _encoder(x, params["encoder"])                 # (B*T, H/8, W/8, 128)
    feat = feat.reshape(B, T, H // 8, W // 8, feat.shape[-1])

    if use_pallas:
        y, states = convlstm_forward_pallas(
            feat, params["convlstm"], HIDDEN_DIMS, roll_sign=roll_sign)
    else:
        y, states = convlstm_forward_reference(feat, params["convlstm"], HIDDEN_DIMS)

    last = y[:, -1]                                       # (B, H/8, W/8, 32)
    img = _decoder(last, params["decoder"])               # (B, H, W, 1)
    return jnp.transpose(img, (0, 3, 1, 2)), y, states


def init_params(key):
    ks = list(jax.random.split(key, 16))

    def conv_w(k, kh, kw, cin, cout):
        return (1.0 / np.sqrt(kh * kw * cin)) * jax.random.normal(
            k, (kh, kw, cin, cout), jnp.float32)

    def bias(k, c):
        return 0.02 * jax.random.normal(k, (c,), jnp.float32)

    enc = [(conv_w(ks[0], 3, 3, 1, 32), bias(ks[1], 32)),
           (conv_w(ks[2], 3, 3, 32, 64), bias(ks[3], 64)),
           (conv_w(ks[4], 3, 3, 64, 128), bias(ks[5], 128))]

    lstm = []
    cin = 128
    for i, ch in enumerate(HIDDEN_DIMS):
        lstm.append((conv_w(ks[6 + 2 * i], KSIZE, KSIZE, cin + ch, 4 * ch),
                     bias(ks[7 + 2 * i], 4 * ch)))
        cin = ch

    dec = [(conv_w(ks[10], 4, 4, 32, 16), bias(ks[11], 16)),
           (conv_w(ks[12], 4, 4, 16, 8), bias(ks[13], 8)),
           (conv_w(ks[14], 4, 4, 8, 1), bias(ks[15], 1))]
    return {"encoder": enc, "convlstm": lstm, "decoder": dec}


if __name__ == "__main__":
    B, T, H_IMG, W_IMG = 2, 4, 64, 64     # encoder /8 -> 8x8 ConvLSTM feature grid

    roll_sign = _probe_roll_convention()  # one-time setup probe, not in the hot path

    key = jax.random.PRNGKey(0)
    k_param, k_input = jax.random.split(key)
    params = init_params(k_param)
    imgs = jax.random.normal(k_input, (B, T, 1, H_IMG, W_IMG), jnp.float32)

    fwd = jax.jit(functools.partial(storm_generator_forward,
                                    roll_sign=roll_sign, use_pallas=True))
    fwd_ref = jax.jit(functools.partial(storm_generator_forward, use_pallas=False))

    out, y, states = fwd(imgs, params)
    out = jax.block_until_ready(out)

    out_ref, y_ref, states_ref = fwd_ref(imgs, params)

    assert out.shape == (B, 1, H_IMG, W_IMG)
    assert y.shape == (B, T, H_IMG // 8, W_IMG // 8, HIDDEN_DIMS[-1])
    assert bool(jnp.allclose(y, y_ref, atol=5e-3, rtol=5e-3))
    for (h, c), (hr, cr) in zip(states, states_ref):
        assert bool(jnp.allclose(h, hr, atol=5e-3, rtol=5e-3))
        assert bool(jnp.allclose(c, cr, atol=5e-3, rtol=5e-3))
    assert bool(jnp.allclose(out, out_ref, atol=5e-3, rtol=5e-3))

    print("KERNEL_OK")
</pallas_src>

<mosaic_0001>
module attributes {stable_mosaic.version = 11 : i64} {
  func.func @k(%arg0: memref<8x128xf32, #tpu.memory_space<vmem>>, %arg1: memref<8x128xf32, #tpu.memory_space<vmem>>) attributes {dimension_semantics = [], scalar_prefetch = 0 : i64, scratch_operands = 0 : i64, tpu.core_type = #tpu.core_type<tc>} {
    %c0 = arith.constant 0 : index
    %c0_0 = arith.constant 0 : index
    %0 = vector.load %arg0[%c0, %c0_0] : memref<8x128xf32, #tpu.memory_space<vmem>>, vector<8x128xf32>
    %c1_i32 = arith.constant 1 : i32
    %1 = tpu.dynamic_rotate %0 by %c1_i32 dim 0 : vector<8x128xf32>, i32 -> vector<8x128xf32>
    %c0_1 = arith.constant 0 : index
    %c0_2 = arith.constant 0 : index
    %2 = vector.load %arg1[%c0_1, %c0_2] : memref<8x128xf32, #tpu.memory_space<vmem>>, vector<8x128xf32>
    tpu.vector_store %arg1[%c0_1, %c0_2], %1 {strides = array<i32>} : memref<8x128xf32, #tpu.memory_space<vmem>>, vector<8x128xf32>,
    return
  }
}

</mosaic_0001>

<bundles_post_ra>
// kernel: tpu_custom_call.1
= control target key start
LH: loop header
LB: loop body
LE: loop exit
PB: predicated region body
PF: predicated region fallthrough
CT: control target
= control target key end

     0   :  { %6 = vsyncpa [#allocation3], 0  ;;  %s125_s0 = inlined_call_operand.hbm [shape: f32[8,128], index: 0, kind: input, shape index: {}]   ;;  %s126_s1 = inlined_call_operand.hbm [shape: f32[8,128], index: 1, kind: output, shape index: {}]  }
   0x1   :  { %7 = vsyncpa [#allocation4], 0  ;;  %s89_s6 = smov [#allocation2]   ;;  %s41_s10 = scalar_lea.hbm %s125_s0, 128 }
   0x2   :  { %s14_s7 = sshll.u32 %s89_s6, 4  ;;  %p42_p0 = scmp.ne.s32.totalorder %s125_s0, %s41_s10  ;;  %s15_s7 = int_to_ptr.vmem [resolvable:$true] %s14_s7 }
   0x3   :  { %p45_p1 = scmp.lt.u32.totalorder %s41_s10, %s125_s0 }
   0x5   :  { %p47_p2 = pnand %p45_p1, %p42_p0 }
   0x7   :  { %50 = shalt.err (!%p47_p2)
}
   0x8   :  { %s51_s15 = scalar_lea.vmem %s15_s7, 128  ;;  %p56_p4 = scmp.lt.s32.totalorder %s15_s7, %s15_s7 }
   0x9   :  { %p52_p3 = scmp.ne.s32.totalorder %s15_s7, %s51_s15  ;;  %p57_p5 = scmp.lt.s32.totalorder %s51_s15, %s51_s15 }
   0xb   :  { %p58_p6 = por %p57_p5, %p56_p4 }
   0xd   :  { %p59_p7 = pnand %p58_p6, %p52_p3 }
   0xf   :  { %62 = shalt.err (!%p59_p7)
}
  0x10   :  { %17 = dma.hbm_to_vmem [thread:$0]  %s125_s0, 128, %s15_s7, [#allocation3]  }
  0x11   :  { %85 = dma.done.wait [#allocation3], 128  }
  0x12   :  { %86 = vsyncadd [#allocation3], 4294967168  ;;  %s90_s18 = smov [#allocation5]   ;;  %v21_v0 = vld [vmem:[#allocation2] sm:$0xff] }
  0x13   :  { %s30_s19 = sshll.u32 %s90_s18, 4  ;;  %v22_v1 = vrot.slane %v21_v0, 7  ;;  %s31_s19 = int_to_ptr.vmem [resolvable:$true] %s30_s19 }
  0x14   :  { %s63_s20 = scalar_lea.vmem %s31_s19, 128  ;;  %p68_p9 = scmp.lt.s32.totalorder %s31_s19, %s31_s19 }
  0x15   :  { %23 = vst [vmem:[#allocation5] sm:$0xff] %v22_v1  ;;  %p64_p8 = scmp.ne.s32.totalorder %s31_s19, %s63_s20  ;;  %p69_p10 = scmp.lt.s32.totalorder %s63_s20, %s63_s20 }
  0x17   :  { %p70_p11 = por %p69_p10, %p68_p9 }
  0x19   :  { %p71_p12 = pnand %p70_p11, %p64_p8 }
  0x1b   :  { %74 = shalt.err (!%p71_p12)
}
  0x1c   :  { %s75_s23 = scalar_lea.hbm %s126_s1, 128 }
  0x1d   :  { %p76_p13 = scmp.ne.s32.totalorder %s126_s1, %s75_s23  ;;  %p79_p0 = scmp.lt.u32.totalorder %s75_s23, %s126_s1 }
  0x1f   :  { %p81_p1 = pnand %p79_p0, %p76_p13 }
  0x21   :  { %84 = shalt.err (!%p81_p1)
}
  0x22   :  { %33 = dma.vmem_to_hbm [thread:$0]  %s31_s19, 128, %s126_s1, [#allocation4]  }
  0x23   :  { %87 = dma.done.wait [#allocation4], 128  }
  0x24   :  { %88 = vsyncadd [#allocation4], 4294967168 }
  0x25   :  { %37 = vsyncpa [#allocation3], 1 }
  0x26   :  { %38 = vsyncpa [#allocation4], 1 }

</bundles_post_ra>
